<compile_context>
chip_gen: v7x
topology: tpu7x:2x2x1
jax: 0.10.0
libtpu: 0.0.40
codegen_flags: <defaults>
</compile_context>

<pallas_src>
import jax
import jax.numpy as jnp
from jax.experimental import pallas as pl
from jax.experimental.pallas import tpu as pltpu

IN_DIM = 2      # fc1 in_features
HID_DIM = 64    # fc1 out_features / fc2 in_features
OUT_DIM = 2     # fc2 out_features

IN_PAD = 8      # sublane-aligned pad for the input features   (2  -> 8)
HID_PAD = 128   # lane-dense hidden width                       (64 -> 128)
OUT_PAD = 8     # sublane-aligned pad for the logits            (2  -> 8)


def _round_up(n, m):
    return (n + m - 1) // m * m


def _mlp_kernel(x_ref, w1_ref, b1_ref, w2_ref, b2_ref, o_ref):
    # fc1 + ReLU.  Padded columns of w1/b1 are zero, so padded hidden lanes
    # are exactly zero and stay zero through the ReLU.
    h = jnp.dot(x_ref[...], w1_ref[...], preferred_element_type=jnp.float32)
    h = jnp.maximum(h + b1_ref[...], 0.0)
    # fc2.  Padded rows of w2 are zero (dead hidden lanes contribute nothing);
    # padded output lanes get zero + zero bias and are sliced off in the wrapper.
    out = jnp.dot(h, w2_ref[...], preferred_element_type=jnp.float32)
    o_ref[...] = (out + b2_ref[...]).astype(o_ref.dtype)


def simplenet_forward(x, params):
    """x: (B, 2) float32.  Returns (B, 2) float32 logits (== torch forward)."""
    w1, b1, w2, b2 = params  # logical shapes: (2,64) (1,64) (64,2) (1,2)
    B = x.shape[0]

    # Batch tile: multiple of 8 sublanes, capped at 256.
    TB = min(256, _round_up(max(B, 1), 8))
    B_pad = _round_up(B, TB)

    # Minimal zero-padding: batch to a TB multiple, feature edges to 8,
    # hidden to a lane-dense 128.
    xp = jnp.pad(x.astype(jnp.float32),
                 ((0, B_pad - B), (0, IN_PAD - IN_DIM)))
    w1p = jnp.pad(w1, ((0, IN_PAD - IN_DIM), (0, HID_PAD - HID_DIM)))
    b1p = jnp.pad(b1, ((0, 0), (0, HID_PAD - HID_DIM)))
    w2p = jnp.pad(w2, ((0, HID_PAD - HID_DIM), (0, OUT_PAD - OUT_DIM)))
    b2p = jnp.pad(b2, ((0, 0), (0, OUT_PAD - OUT_DIM)))

    grid = (B_pad // TB,)

    # Advisory cost for XLA scheduling around the custom call.
    flops = 2 * B_pad * (IN_PAD * HID_PAD + HID_PAD * OUT_PAD)
    bytes_accessed = 4 * (B_pad * (IN_PAD + OUT_PAD)      # x in + logits out
                          + IN_PAD * HID_PAD              # w1
                          + HID_PAD * OUT_PAD             # w2
                          + HID_PAD + OUT_PAD)            # b1, b2

    out_pad = pl.pallas_call(
        _mlp_kernel,
        out_shape=jax.ShapeDtypeStruct((B_pad, OUT_PAD), jnp.float32),
        grid=grid,
        in_specs=[
            pl.BlockSpec((TB, IN_PAD), lambda i: (i, 0)),        # x: streamed per tile
            pl.BlockSpec((IN_PAD, HID_PAD), lambda i: (0, 0)),   # w1: resident
            pl.BlockSpec((1, HID_PAD), lambda i: (0, 0)),        # b1: resident
            pl.BlockSpec((HID_PAD, OUT_PAD), lambda i: (0, 0)),  # w2: resident
            pl.BlockSpec((1, OUT_PAD), lambda i: (0, 0)),        # b2: resident
        ],
        out_specs=pl.BlockSpec((TB, OUT_PAD), lambda i: (i, 0)),
        compiler_params=pltpu.CompilerParams(
            dimension_semantics=("parallel",),   # shard batch axis across TCs (v7x)
            vmem_limit_bytes=32 * 1024 * 1024,   # explicit; tiny working set, safe everywhere
        ),
        cost_estimate=pl.CostEstimate(
            flops=flops, transcendentals=0, bytes_accessed=bytes_accessed),
    )(xp, w1p, b1p, w2p, b2p)

    return out_pad[:B, :OUT_DIM]


def init_params(key):
    """Deterministic params mirroring torch.nn.Linear default init
    (uniform in [-1/sqrt(fan_in), 1/sqrt(fan_in)]); weights stored transposed
    as (in_features, out_features) so the kernel computes y = x @ W + b."""
    dims = [(IN_DIM, HID_DIM), (HID_DIM, OUT_DIM)]
    params = []
    for fan_in, fan_out in dims:
        key, kw, kb = jax.random.split(key, 3)
        bound = 1.0 / jnp.sqrt(jnp.float32(fan_in))
        w = jax.random.uniform(kw, (fan_in, fan_out), jnp.float32,
                               minval=-bound, maxval=bound)
        # bias kept 2-D (1, fan_out) for a clean lane-major broadcast in-kernel
        b = jax.random.uniform(kb, (1, fan_out), jnp.float32,
                               minval=-bound, maxval=bound)
        params.extend([w, b])
    return tuple(params)


def reference_forward(x, params):
    """Plain-JAX reference (matches the PyTorch forward)."""
    w1, b1, w2, b2 = params
    h = jnp.maximum(x @ w1 + b1, 0.0)
    return h @ w2 + b2


if __name__ == "__main__":
    key = jax.random.PRNGKey(0)
    k_params, k_x = jax.random.split(key)

    params = init_params(k_params)
    # Small batch of 2-feature inputs, matching SimpleNet's expected input.
    x = jax.random.normal(k_x, (8, IN_DIM), jnp.float32)

    out = simplenet_forward(x, params)
    out = jax.block_until_ready(out)

    ref = reference_forward(x, params)
    assert out.shape == (8, OUT_DIM), out.shape
    assert jnp.allclose(out, ref, atol=1e-5, rtol=1e-5), "mismatch vs reference"

    print("KERNEL_OK")
</pallas_src>

<mosaic_0001>
module attributes {stable_mosaic.version = 11 : i64} {
  func.func @_mlp_kernel(%arg0: i32, %arg1: memref<8x8xf32, #tpu.memory_space<vmem>>, %arg2: memref<8x128xf32, #tpu.memory_space<vmem>>, %arg3: memref<1x128xf32, #tpu.memory_space<vmem>>, %arg4: memref<128x8xf32, #tpu.memory_space<vmem>>, %arg5: memref<1x8xf32, #tpu.memory_space<vmem>>, %arg6: memref<8x8xf32, #tpu.memory_space<vmem>>) attributes {dimension_semantics = [#tpu.dimension_semantics<parallel>], iteration_bounds = array<i64: 1>, scalar_prefetch = 0 : i64, scratch_operands = 0 : i64, tpu.core_type = #tpu.core_type<tc>, window_params = [{transform_indices = @transform_0, window_bounds = array<i64: 8, 8>}, {pipeline_mode = #tpu.pipeline_mode<synchronous>, transform_indices = @transform_1, window_bounds = array<i64: 8, 128>}, {pipeline_mode = #tpu.pipeline_mode<synchronous>, transform_indices = @transform_2, window_bounds = array<i64: 1, 128>}, {pipeline_mode = #tpu.pipeline_mode<synchronous>, transform_indices = @transform_3, window_bounds = array<i64: 128, 8>}, {pipeline_mode = #tpu.pipeline_mode<synchronous>, transform_indices = @transform_4, window_bounds = array<i64: 1, 8>}, {transform_indices = @transform_5, window_bounds = array<i64: 8, 8>}]} {
    %c0 = arith.constant 0 : index
    %c0_0 = arith.constant 0 : index
    %0 = vector.load %arg1[%c0, %c0_0] : memref<8x8xf32, #tpu.memory_space<vmem>>, vector<8x8xf32>
    %c0_1 = arith.constant 0 : index
    %c0_2 = arith.constant 0 : index
    %1 = vector.load %arg2[%c0_1, %c0_2] : memref<8x128xf32, #tpu.memory_space<vmem>>, vector<8x128xf32>
    %cst = arith.constant dense<0.000000e+00> : vector<8x128xf32>
    %2 = tpu.matmul %0, %1, %cst {dimension_numbers = #tpu.dot_dimension_numbers<[1], [0], [0], [1], [0, 0, 1, 1], [], []>} : vector<8x8xf32>, vector<8x128xf32>, vector<8x128xf32> -> vector<8x128xf32>
    %c0_3 = arith.constant 0 : index
    %c0_4 = arith.constant 0 : index
    %3 = vector.load %arg3[%c0_3, %c0_4] : memref<1x128xf32, #tpu.memory_space<vmem>>, vector<1x128xf32>
    %4 = vector.broadcast %3 : vector<1x128xf32> to vector<8x128xf32>
    %5 = arith.addf %2, %4 : vector<8x128xf32>
    %cst_5 = arith.constant 0.000000e+00 : f32
    %6 = vector.broadcast %cst_5 : f32 to vector<8x128xf32>
    %7 = arith.maximumf %5, %6 : vector<8x128xf32>
    %c0_6 = arith.constant 0 : index
    %c0_7 = arith.constant 0 : index
    %8 = vector.load %arg4[%c0_6, %c0_7] : memref<128x8xf32, #tpu.memory_space<vmem>>, vector<128x8xf32>
    %cst_8 = arith.constant dense<0.000000e+00> : vector<8x8xf32>
    %9 = tpu.matmul %7, %8, %cst_8 {dimension_numbers = #tpu.dot_dimension_numbers<[1], [0], [0], [1], [0, 0, 1, 1], [], []>} : vector<8x128xf32>, vector<128x8xf32>, vector<8x8xf32> -> vector<8x8xf32>
    %c0_9 = arith.constant 0 : index
    %c0_10 = arith.constant 0 : index
    %10 = vector.load %arg5[%c0_9, %c0_10] : memref<1x8xf32, #tpu.memory_space<vmem>>, vector<1x8xf32>
    %11 = vector.broadcast %10 : vector<1x8xf32> to vector<8x8xf32>
    %12 = arith.addf %9, %11 : vector<8x8xf32>
    %c0_11 = arith.constant 0 : index
    %c0_12 = arith.constant 0 : index
    %13 = vector.load %arg6[%c0_11, %c0_12] : memref<8x8xf32, #tpu.memory_space<vmem>>, vector<8x8xf32>
    tpu.vector_store %arg6[%c0_11, %c0_12], %12 {strides = array<i32>} : memref<8x8xf32, #tpu.memory_space<vmem>>, vector<8x8xf32>,
    return
  }
  func.func @transform_0(%arg0: i32) -> (i32, i32) {
    %c0_i32 = arith.constant 0 : i32
    %c0_i32_0 = arith.constant 0 : i32
    return %arg0, %c0_i32 : i32, i32
  }
  func.func @transform_1(%arg0: i32) -> (i32, i32) {
    %c0_i32 = arith.constant 0 : i32
    %c0_i32_0 = arith.constant 0 : i32
    %c0_i32_1 = arith.constant 0 : i32
    return %c0_i32, %c0_i32_0 : i32, i32
  }
  func.func @transform_2(%arg0: i32) -> (i32, i32) {
    %c0_i32 = arith.constant 0 : i32
    %c0_i32_0 = arith.constant 0 : i32
    %c0_i32_1 = arith.constant 0 : i32
    return %c0_i32, %c0_i32_0 : i32, i32
  }
  func.func @transform_3(%arg0: i32) -> (i32, i32) {
    %c0_i32 = arith.constant 0 : i32
    %c0_i32_0 = arith.constant 0 : i32
    %c0_i32_1 = arith.constant 0 : i32
    return %c0_i32, %c0_i32_0 : i32, i32
  }
  func.func @transform_4(%arg0: i32) -> (i32, i32) {
    %c0_i32 = arith.constant 0 : i32
    %c0_i32_0 = arith.constant 0 : i32
    %c0_i32_1 = arith.constant 0 : i32
    return %c0_i32, %c0_i32_0 : i32, i32
  }
  func.func @transform_5(%arg0: i32) -> (i32, i32) {
    %c0_i32 = arith.constant 0 : i32
    %c0_i32_0 = arith.constant 0 : i32
    return %arg0, %c0_i32 : i32, i32
  }
}

</mosaic_0001>

<bundles_post_ra>
// kernel: tpu_custom_call.1
= control target key start
LH: loop header
LB: loop body
LE: loop exit
PB: predicated region body
PF: predicated region fallthrough
CT: control target
= control target key end

     0   :  { %vm30_vm0 = vcmask 64512   ;;  %v327_v2 = vmov 0.0   ;;  %vm328_vm1 = vmmov 0   ;;  %v329_v6 = vmov 0.0|0.0   ;;  %s435_s0 = inlined_call_operand.vmem [shape: f32[8,8], index: 0, kind: input, shape index: {}]   ;;  %s436_s1 = inlined_call_operand.vmem [shape: f32[8,128], index: 1, kind: input, shape index: {}]   ;;  %s437_s2 = inlined_call_operand.vmem [shape: f32[1,128], index: 2, kind: input, shape index: {}]   ;;  %s438_s3 = inlined_call_operand.vmem [shape: f32[128,8], index: 3, kind: input, shape index: {}]   ;;  %s439_s4 = inlined_call_operand.vmem [shape: f32[1,8], index: 4, kind: input, shape index: {}]   ;;  %s440_s5 = inlined_call_operand.hbm [shape: f32[8,8], index: 5, kind: output, shape index: {}]  }
   0x1   :  { %v22_v0 = vld [vmem:[%s436_s1] sm:$0xff]  ;;  %235 = vmatprep.subr.mxu0 %v327_v2  ;;  %237 = vmatprep.mubr.msk.f32.mxu0 %vm328_vm1, %v327_v2  ;;  %v106_v4 = vld [vmem:[%s438_s3 + $0x8] sm:$0xff]  ;;  %v107_v5 = vld [vmem:[%s438_s3 + $0x10] sm:$0xff] }
   0x2   :  { %v21_v1 = vld [vmem:[%s435_s0] sm:$0xff]  ;;  %236 = vmatpush3.msra.mxu0 %v22_v0  ;;  %275 = vmatprep.subr.bf16.mxu1 %v329_v6  ;;  %v108_v8 = vld [vmem:[%s438_s3 + $0x18] sm:$0xff]  ;;  %v110_v11 = vld [vmem:[%s438_s3 + $0x28] sm:$0xff] }
   0x3   :  { %v105_v3 = vld [vmem:[%s438_s3] sm:$0xff]  ;;  %238 = vmatmul.mubr.msk.f32.vlgmr.msra.gmra.mrb[0].mxu0 %vm30_vm0, %v21_v1  ;;  %272 = vmatprep.mubr.msk.f32.mxu1 %vm328_vm1, %v327_v2  ;;  %v279_v9 = vpack.c.bf16 %v108_v8, %v107_v5 }
   0x4   :  { %v276_v7 = vpack.c.bf16 %v106_v4, %v105_v3  ;;  %v109_v10 = vld [vmem:[%s438_s3 + $0x20] sm:$0xff] }
   0x6   :  { %277 = vmatpush3.bf16.msra.mxu1 %v276_v7 }
   0x7   :  { %278 = vmatprep.subr.bf16.mxu1 %v329_v6 }
   0x8   :  { %10 = vsyncpa [#allocation3], 0  ;;  %v282_v12 = vpack.c.bf16 %v110_v11, %v109_v10  ;;  %v111_v13 = vld [vmem:[%s438_s3 + $0x30] sm:$0xff]  ;;  %v112_v14 = vld [vmem:[%s438_s3 + $0x38] sm:$0xff]  ;;  %s330_s29 = smov [#allocation2]  }
   0x9   :  { %v285_v15 = vpack.c.bf16 %v112_v14, %v111_v13  ;;  %v113_v16 = vld [vmem:[%s438_s3 + $0x40] sm:$0xff]  ;;  %v114_v17 = vld [vmem:[%s438_s3 + $0x48] sm:$0xff]  ;;  %v115_v19 = vld [vmem:[%s438_s3 + $0x50] sm:$0xff]  ;;  %s205_s30 = sshll.u32 %s330_s29, 4  ;;  %s206_s30 = int_to_ptr.vmem [resolvable:$true] %s205_s30 }
   0xa   :  { %280 = vmatpush3.bf16.msra.mxu1 %v279_v9  ;;  %v288_v18 = vpack.c.bf16 %v114_v17, %v113_v16  ;;  %v116_v20 = vld [vmem:[%s438_s3 + $0x58] sm:$0xff]  ;;  %v117_v22 = vld [vmem:[%s438_s3 + $0x60] sm:$0xff]  ;;  %v118_v23 = vld [vmem:[%s438_s3 + $0x68] sm:$0xff]  ;;  %p308_p1 = scmp.lt.s32.totalorder %s206_s30, %s206_s30 }
   0xb   :  { %281 = vmatprep.subr.bf16.mxu1 %v329_v6  ;;  %v291_v21 = vpack.c.bf16 %v116_v20, %v115_v19  ;;  %v294_v24 = vpack.c.bf16 %v118_v23, %v117_v22  ;;  %v119_v25 = vld [vmem:[%s438_s3 + $0x70] sm:$0xff]  ;;  %v120_v26 = vld [vmem:[%s438_s3 + $0x78] sm:$0xff]  ;;  %v213_v28 = vld [vmem:[%s437_s2] ss:$0 sm:$0xff]  ;;  %s303_s3 = scalar_lea.vmem %s206_s30, 128 }
   0xc   :  { %v297_v27 = vpack.c.bf16 %v120_v26, %v119_v25  ;;  %v215_v33 = vld [vmem:[%s439_s4] ss:$0 sm:$0xff]  ;;  %p304_p0 = scmp.ne.s32.totalorder %s206_s30, %s303_s3  ;;  %p309_p2 = scmp.lt.s32.totalorder %s303_s3, %s303_s3 }
   0xe   :  { %283 = vmatpush3.bf16.msra.mxu1 %v282_v12  ;;  %p310_p3 = por %p309_p2, %p308_p1 }
   0xf   :  { %284 = vmatprep.subr.bf16.mxu1 %v329_v6 }
  0x10   :  { %p311_p4 = pnand %p310_p3, %p304_p0 }
  0x12   :  { %286 = vmatpush3.bf16.msra.mxu1 %v285_v15 }
  0x13   :  { %287 = vmatprep.subr.bf16.mxu1 %v329_v6 }
  0x16   :  { %289 = vmatpush3.bf16.msra.mxu1 %v288_v18 }
  0x17   :  { %290 = vmatprep.subr.bf16.mxu1 %v329_v6 }
  0x1a   :  { %292 = vmatpush3.bf16.msra.mxu1 %v291_v21 }
  0x1b   :  { %293 = vmatprep.subr.bf16.mxu1 %v329_v6 }
  0x1e   :  { %295 = vmatpush3.bf16.msra.mxu1 %v294_v24 }
  0x1f   :  { %296 = vmatprep.subr.bf16.mxu1 %v329_v6 }
  0x22   :  { %298 = vmatpush3.bf16.msra.mxu1 %v297_v27 }
  0xd6   :  { %v100_v29 = vpop.f32.mrb[0].mxu0 }
  0xd7   :  { %v101_v30 = vadd.f32 %v213_v28, %v100_v29  ;;  %v239_v31 = vpop.f32.mrb[1].mxu0 }
  0xd9   :  { %v104_v32 = vmax.f32 %v101_v30, 0.0 }
  0xdb   :  { %273 = vmatmul.mubr.f32.vlgmr.msra.gmra.mrb[0].mxu1 %v104_v32 }
 0x1ae   :  { %v194_v34 = vpop.f32.mrb[0].mxu1 }
 0x1af   :  { %v195_v35 = vadd.f32 %v215_v33, %v194_v34  ;;  %v274_v36 = vpop.f32.mrb[1].mxu1 }
 0x1b1   :  { %198 = vst.msk [vmem:[#allocation2] sm:$0xff] %vm30_vm0, %v195_v35 }
 0x1b2   :  { %314 = shalt.err (!%p311_p4)
}
 0x1b3   :  { %s315_s7 = scalar_lea.hbm %s440_s5, 128 }
 0x1b4   :  { %p316_p5 = scmp.ne.s32.totalorder %s440_s5, %s315_s7  ;;  %p319_p6 = scmp.lt.u32.totalorder %s315_s7, %s440_s5 }
 0x1b6   :  { %p321_p7 = pnand %p319_p6, %p316_p5 }
 0x1b8   :  { %324 = shalt.err (!%p321_p7)
}
 0x1b9   :  { %208 = dma.vmem_to_hbm [thread:$0]  %s206_s30, 128, %s440_s5, [#allocation3]  }
 0x1ba   :  { %325 = dma.done.wait [#allocation3], 128  }
 0x1bb   :  { %326 = vsyncadd [#allocation3], 4294967168 }
 0x1bc   :  { %212 = vsyncpa [#allocation3], 1 }

</bundles_post_ra>
